<compile_context>
chip_gen: v7x
topology: tpu7x:2x2x1
jax: 0.10.0
libtpu: 0.0.40
codegen_flags: <defaults>
</compile_context>

<pallas_src>
import math
import jax
import jax.numpy as jnp
from jax.experimental import pallas as pl
from jax.experimental.pallas import tpu as pltpu


def _sigmoid(z):
    # exp() runs on the EUP; approx=True routes the reciprocal to the EUP as well
    # (vrcp) instead of a VALU reciprocal + Newton steps. Accuracy ~1e-3, well
    # inside the module's tolerance.
    return pl.reciprocal(1.0 + jnp.exp(-z), approx=True)


def _se_kernel(x_ref, m_ref, w1_ref, b1_ref, w2_ref, b2_ref, o_ref):
    # x_ref : (1, dim, TL)        input tile (channels on sublanes, L on lanes)
    # m_ref : (dim, dim)          lower-triangular cumulative-mean matrix (x dtype)
    # w1_ref: (dim_inner, dim)    1x1 conv #1 weight (x dtype)
    # b1_ref: (dim_inner, 1)      1x1 conv #1 bias (f32)
    # w2_ref: (dim, dim_inner)    1x1 conv #2 weight (x dtype)
    # b2_ref: (dim, 1)            1x1 conv #2 bias (f32)
    # o_ref : (1, dim, TL)        output tile
    x = x_ref[0]  # keep native dtype: bf16 feeds the MXU directly on v6e/v7x

    # Cumulative mean over the channel axis as one MXU matmul, f32 accumulation.
    cum_mean = jnp.dot(m_ref[...], x, preferred_element_type=jnp.float32)

    # 1x1 conv -> SiLU
    h = jnp.dot(w1_ref[...], cum_mean.astype(w1_ref.dtype),
                preferred_element_type=jnp.float32) + b1_ref[...]
    h = h * _sigmoid(h)

    # 1x1 conv -> Sigmoid gate
    g = jnp.dot(w2_ref[...], h.astype(w2_ref.dtype),
                preferred_element_type=jnp.float32) + b2_ref[...]
    gate = _sigmoid(g)

    o_ref[0] = (x.astype(jnp.float32) * gate).astype(o_ref.dtype)


def _tpu_kind():
    try:
        return jax.devices()[0].device_kind.lower()
    except Exception:
        return ""


def _vmem_limit_bytes(kind):
    if "v7" in kind:
        return 48 * 1024 * 1024   # 64 MiB physical per TC; leave headroom for scratch
    return 96 * 1024 * 1024       # v5e / v6e: 128 MiB physical


def _choose_l_tile(L, B, dim, x_itemsize, kind, vmem_budget):
    """Generation-aware L tile: full L when small, otherwise a 128-multiple tile
    bounded by the VMEM budget; grid uses pl.cdiv so arbitrary L is handled by
    Pallas-masked edge blocks (every output column is independent)."""
    target = 1024 if "v7" in kind else 2048
    # Double-buffered in+out x tiles plus ~3 f32 working arrays of shape (dim, TL);
    # reserve the other ~40% of the budget for single-buffered constants + scratch.
    per_col = 4 * dim * x_itemsize + 3 * dim * 4
    tl_cap = max(128, ((int(0.6 * vmem_budget) // max(per_col, 1)) // 128) * 128)
    if L <= min(target, tl_cap):
        return L
    tl = min(target, tl_cap)
    if "v7" in kind:
        # Keep >= ~4 parallel grid steps so both v7x TensorCores stay busy.
        while tl > 128 and B * (-(-L // tl)) < 4:
            tl = max(128, ((tl // 2) // 128) * 128)
    return tl


def squeeze_excite(x, w1, b1, w2, b2):
    """x: (B, dim, L); w1: (dim_inner, dim); b1: (dim_inner,);
    w2: (dim, dim_inner); b2: (dim,). Returns (B, dim, L) = x * gate,
    matching the PyTorch SqueezeExcite forward."""
    B, dim, L = x.shape
    dim_inner = w1.shape[0]

    kind = _tpu_kind()
    vmem_limit = _vmem_limit_bytes(kind)
    TL = _choose_l_tile(L, B, dim, jnp.dtype(x.dtype).itemsize, kind, vmem_limit)
    num_l = pl.cdiv(L, TL)

    # Feed the MXU in the input's native dtype (bf16-native on v6e/v7x); keep the
    # exact f32 path for f32 inputs. Biases are added post-accumulation in f32.
    param_dtype = jnp.bfloat16 if x.dtype == jnp.bfloat16 else jnp.float32

    # Lower-triangular cumulative-mean matrix: M[i, j] = 1/(i+1) for j <= i.
    idx = jnp.arange(dim, dtype=jnp.int32)
    m = jnp.where(idx[None, :] <= idx[:, None], 1.0, 0.0).astype(jnp.float32)
    m = (m / (idx[:, None].astype(jnp.float32) + 1.0)).astype(param_dtype)
    # TODO(synk): for very large dim on v7x, replace M@x with a log2(dim) pltpu.roll
    # shifted-add scan over sublanes to free MXU time and the dim^2 VMEM held by M.

    w1c = w1.astype(param_dtype)
    w2c = w2.astype(param_dtype)
    b1c = b1.reshape(dim_inner, 1).astype(jnp.float32)
    b2c = b2.reshape(dim, 1).astype(jnp.float32)

    # Grid-invariant operands: single-buffer so they don't double their VMEM footprint.
    const_buf = pl.Buffered(1)

    return pl.pallas_call(
        _se_kernel,
        out_shape=jax.ShapeDtypeStruct((B, dim, L), x.dtype),
        grid_spec=pltpu.PrefetchScalarGridSpec(
            num_scalar_prefetch=0,
            grid=(B, num_l),
            in_specs=[
                # x tile: default double-buffering (raise to pl.Buffered(3) only if a
                # profile still shows exposed DMA waits after enlarging TL).
                pl.BlockSpec((1, dim, TL), lambda b, l: (b, 0, l)),
                pl.BlockSpec((dim, dim), lambda b, l: (0, 0), pipeline_mode=const_buf),
                pl.BlockSpec((dim_inner, dim), lambda b, l: (0, 0), pipeline_mode=const_buf),
                pl.BlockSpec((dim_inner, 1), lambda b, l: (0, 0), pipeline_mode=const_buf),
                pl.BlockSpec((dim, dim_inner), lambda b, l: (0, 0), pipeline_mode=const_buf),
                pl.BlockSpec((dim, 1), lambda b, l: (0, 0), pipeline_mode=const_buf),
            ],
            out_specs=pl.BlockSpec((1, dim, TL), lambda b, l: (b, 0, l)),
        ),
        compiler_params=pltpu.CompilerParams(
            dimension_semantics=("parallel", "parallel"),
            vmem_limit_bytes=vmem_limit,
        ),
    )(x, m, w1c, b1c, w2c, b2c)


def squeeze_excite_ref(x, w1, b1, w2, b2):
    """Pure-JAX reference mirroring the PyTorch forward exactly."""
    _, dim, _ = x.shape
    denom = jnp.arange(1, dim + 1, dtype=jnp.float32)[None, :, None]
    cum_mean = jnp.cumsum(x.astype(jnp.float32), axis=1) / denom
    h = jnp.einsum("oc,bcl->bol", w1, cum_mean) + b1[None, :, None]
    h = h * (1.0 / (1.0 + jnp.exp(-h)))                 # SiLU
    g = jnp.einsum("oc,bcl->bol", w2, h) + b2[None, :, None]
    gate = 1.0 / (1.0 + jnp.exp(-g))                    # Sigmoid
    return (x.astype(jnp.float32) * gate).astype(x.dtype)


def init_params(key, dim, reduction_factor=4, dim_minimum=8):
    """PyTorch Conv1d(k=1) default init: U(-1/sqrt(fan_in), 1/sqrt(fan_in))."""
    dim_inner = max(dim_minimum, dim // reduction_factor)
    k1, k2, k3, k4 = jax.random.split(key, 4)
    bnd1 = 1.0 / math.sqrt(dim)
    bnd2 = 1.0 / math.sqrt(dim_inner)
    w1 = jax.random.uniform(k1, (dim_inner, dim), minval=-bnd1, maxval=bnd1, dtype=jnp.float32)
    b1 = jax.random.uniform(k2, (dim_inner,), minval=-bnd1, maxval=bnd1, dtype=jnp.float32)
    w2 = jax.random.uniform(k3, (dim, dim_inner), minval=-bnd2, maxval=bnd2, dtype=jnp.float32)
    b2 = jax.random.uniform(k4, (dim,), minval=-bnd2, maxval=bnd2, dtype=jnp.float32)
    return w1, b1, w2, b2


if __name__ == "__main__":
    B, dim, L = 2, 32, 16          # small shapes consistent with the module
    key = jax.random.PRNGKey(0)
    kx, kp = jax.random.split(key)
    x = jax.random.normal(kx, (B, dim, L), dtype=jnp.float32)
    w1, b1, w2, b2 = init_params(kp, dim)

    out = squeeze_excite(x, w1, b1, w2, b2)
    jax.block_until_ready(out)
    assert out.shape == (B, dim, L), out.shape

    ref = squeeze_excite_ref(x, w1, b1, w2, b2)
    assert bool(jnp.allclose(out, ref, rtol=1e-2, atol=1e-2)), (
        float(jnp.max(jnp.abs(out - ref))))

    print("KERNEL_OK")
</pallas_src>

<mosaic_0001>
module attributes {stable_mosaic.version = 11 : i64} {
  func.func @_se_kernel(%arg0: i32, %arg1: i32, %arg2: memref<1x32x16xf32, #tpu.memory_space<vmem>>, %arg3: memref<32x32xf32, #tpu.memory_space<vmem>>, %arg4: memref<8x32xf32, #tpu.memory_space<vmem>>, %arg5: memref<8x1xf32, #tpu.memory_space<vmem>>, %arg6: memref<32x8xf32, #tpu.memory_space<vmem>>, %arg7: memref<32x1xf32, #tpu.memory_space<vmem>>, %arg8: memref<1x32x16xf32, #tpu.memory_space<vmem>>) attributes {dimension_semantics = [#tpu.dimension_semantics<parallel>, #tpu.dimension_semantics<parallel>], iteration_bounds = array<i64: 2, 1>, scalar_prefetch = 0 : i64, scratch_operands = 0 : i64, tpu.core_type = #tpu.core_type<tc>, window_params = [{transform_indices = @transform_0, window_bounds = array<i64: 1, 32, 16>}, {pipeline_mode = #tpu.pipeline_mode<synchronous>, transform_indices = @transform_1, window_bounds = array<i64: 32, 32>}, {pipeline_mode = #tpu.pipeline_mode<synchronous>, transform_indices = @transform_2, window_bounds = array<i64: 8, 32>}, {pipeline_mode = #tpu.pipeline_mode<synchronous>, transform_indices = @transform_3, window_bounds = array<i64: 8, 1>}, {pipeline_mode = #tpu.pipeline_mode<synchronous>, transform_indices = @transform_4, window_bounds = array<i64: 32, 8>}, {pipeline_mode = #tpu.pipeline_mode<synchronous>, transform_indices = @transform_5, window_bounds = array<i64: 32, 1>}, {transform_indices = @transform_6, window_bounds = array<i64: 1, 32, 16>}]} {
    %c0 = arith.constant 0 : index
    %c0_0 = arith.constant 0 : index
    %c0_1 = arith.constant 0 : index
    %0 = vector.load %arg2[%c0, %c0_0, %c0_1] : memref<1x32x16xf32, #tpu.memory_space<vmem>>, vector<1x32x16xf32>
    %1 = vector.shape_cast %0 : vector<1x32x16xf32> to vector<32x16xf32>
    %c0_2 = arith.constant 0 : index
    %c0_3 = arith.constant 0 : index
    %2 = vector.load %arg3[%c0_2, %c0_3] : memref<32x32xf32, #tpu.memory_space<vmem>>, vector<32x32xf32>
    %cst = arith.constant dense<0.000000e+00> : vector<32x16xf32>
    %3 = tpu.matmul %2, %1, %cst {dimension_numbers = #tpu.dot_dimension_numbers<[1], [0], [0], [1], [0, 0, 1, 1], [], []>} : vector<32x32xf32>, vector<32x16xf32>, vector<32x16xf32> -> vector<32x16xf32>
    %c0_4 = arith.constant 0 : index
    %c0_5 = arith.constant 0 : index
    %4 = vector.load %arg4[%c0_4, %c0_5] : memref<8x32xf32, #tpu.memory_space<vmem>>, vector<8x32xf32>
    %cst_6 = arith.constant dense<0.000000e+00> : vector<8x16xf32>
    %5 = tpu.matmul %4, %3, %cst_6 {dimension_numbers = #tpu.dot_dimension_numbers<[1], [0], [0], [1], [0, 0, 1, 1], [], []>} : vector<8x32xf32>, vector<32x16xf32>, vector<8x16xf32> -> vector<8x16xf32>
    %c0_7 = arith.constant 0 : index
    %c0_8 = arith.constant 0 : index
    %6 = vector.load %arg5[%c0_7, %c0_8] : memref<8x1xf32, #tpu.memory_space<vmem>>, vector<8x1xf32>
    %7 = vector.broadcast %6 : vector<8x1xf32> to vector<8x16xf32>
    %8 = arith.addf %5, %7 : vector<8x16xf32>
    %cst_9 = arith.constant 0.000000e+00 : f32
    %9 = vector.broadcast %cst_9 : f32 to vector<8x16xf32>
    %10 = arith.subf %9, %8 : vector<8x16xf32>
    %11 = math.exp %10 : vector<8x16xf32>
    %cst_10 = arith.constant 1.000000e+00 : f32
    %12 = vector.broadcast %cst_10 : f32 to vector<8x16xf32>
    %13 = arith.addf %12, %11 : vector<8x16xf32>
    %14 = tpu.reciprocal %13 {approx = true} : vector<8x16xf32> -> vector<8x16xf32>
    %15 = arith.mulf %8, %14 : vector<8x16xf32>
    %c0_11 = arith.constant 0 : index
    %c0_12 = arith.constant 0 : index
    %16 = vector.load %arg6[%c0_11, %c0_12] : memref<32x8xf32, #tpu.memory_space<vmem>>, vector<32x8xf32>
    %cst_13 = arith.constant dense<0.000000e+00> : vector<32x16xf32>
    %17 = tpu.matmul %16, %15, %cst_13 {dimension_numbers = #tpu.dot_dimension_numbers<[1], [0], [0], [1], [0, 0, 1, 1], [], []>} : vector<32x8xf32>, vector<8x16xf32>, vector<32x16xf32> -> vector<32x16xf32>
    %c0_14 = arith.constant 0 : index
    %c0_15 = arith.constant 0 : index
    %18 = vector.load %arg7[%c0_14, %c0_15] : memref<32x1xf32, #tpu.memory_space<vmem>>, vector<32x1xf32>
    %19 = vector.broadcast %18 : vector<32x1xf32> to vector<32x16xf32>
    %20 = arith.addf %17, %19 : vector<32x16xf32>
    %cst_16 = arith.constant 0.000000e+00 : f32
    %21 = vector.broadcast %cst_16 : f32 to vector<32x16xf32>
    %22 = arith.subf %21, %20 : vector<32x16xf32>
    %23 = math.exp %22 : vector<32x16xf32>
    %cst_17 = arith.constant 1.000000e+00 : f32
    %24 = vector.broadcast %cst_17 : f32 to vector<32x16xf32>
    %25 = arith.addf %24, %23 : vector<32x16xf32>
    %26 = tpu.reciprocal %25 {approx = true} : vector<32x16xf32> -> vector<32x16xf32>
    %27 = arith.mulf %1, %26 : vector<32x16xf32>
    %c0_18 = arith.constant 0 : index
    %c0_19 = arith.constant 0 : index
    %c0_20 = arith.constant 0 : index
    %28 = vector.load %arg8[%c0_18, %c0_19, %c0_20] : memref<1x32x16xf32, #tpu.memory_space<vmem>>, vector<1x32x16xf32>
    %29 = vector.shape_cast %28 : vector<1x32x16xf32> to vector<32x16xf32>
    %30 = vector.shape_cast %27 : vector<32x16xf32> to vector<1x32x16xf32>
    tpu.vector_store %arg8[%c0_18, %c0_19, %c0_20], %30 {strides = array<i32>} : memref<1x32x16xf32, #tpu.memory_space<vmem>>, vector<1x32x16xf32>,
    return
  }
  func.func @transform_0(%arg0: i32, %arg1: i32) -> (i32, i32, i32) {
    %c0_i32 = arith.constant 0 : i32
    %c0_i32_0 = arith.constant 0 : i32
    return %arg0, %c0_i32, %arg1 : i32, i32, i32
  }
  func.func @transform_1(%arg0: i32, %arg1: i32) -> (i32, i32) {
    %c0_i32 = arith.constant 0 : i32
    %c0_i32_0 = arith.constant 0 : i32
    %c0_i32_1 = arith.constant 0 : i32
    return %c0_i32, %c0_i32_0 : i32, i32
  }
  func.func @transform_2(%arg0: i32, %arg1: i32) -> (i32, i32) {
    %c0_i32 = arith.constant 0 : i32
    %c0_i32_0 = arith.constant 0 : i32
    %c0_i32_1 = arith.constant 0 : i32
    return %c0_i32, %c0_i32_0 : i32, i32
  }
  func.func @transform_3(%arg0: i32, %arg1: i32) -> (i32, i32) {
    %c0_i32 = arith.constant 0 : i32
    %c0_i32_0 = arith.constant 0 : i32
    %c0_i32_1 = arith.constant 0 : i32
    return %c0_i32, %c0_i32_0 : i32, i32
  }
  func.func @transform_4(%arg0: i32, %arg1: i32) -> (i32, i32) {
    %c0_i32 = arith.constant 0 : i32
    %c0_i32_0 = arith.constant 0 : i32
    %c0_i32_1 = arith.constant 0 : i32
    return %c0_i32, %c0_i32_0 : i32, i32
  }
  func.func @transform_5(%arg0: i32, %arg1: i32) -> (i32, i32) {
    %c0_i32 = arith.constant 0 : i32
    %c0_i32_0 = arith.constant 0 : i32
    %c0_i32_1 = arith.constant 0 : i32
    return %c0_i32, %c0_i32_0 : i32, i32
  }
  func.func @transform_6(%arg0: i32, %arg1: i32) -> (i32, i32, i32) {
    %c0_i32 = arith.constant 0 : i32
    %c0_i32_0 = arith.constant 0 : i32
    return %arg0, %c0_i32, %arg1 : i32, i32, i32
  }
}

</mosaic_0001>

<bundles_post_ra>
// kernel: tpu_custom_call.1
= control target key start
LH: loop header
LB: loop body
LE: loop exit
PB: predicated region body
PF: predicated region fallthrough
CT: control target
= control target key end

     0   :  { %s1778_s0 = inlined_call_operand.hbm [shape: f32[2,32,16], index: 0, kind: input, shape index: {}]   ;;  %s1779_s1 = inlined_call_operand.hbm [shape: f32[32,32], index: 1, kind: input, shape index: {}]   ;;  %s1780_s2 = inlined_call_operand.hbm [shape: f32[8,32], index: 2, kind: input, shape index: {}]   ;;  %s1781_s3 = inlined_call_operand.hbm [shape: f32[8,1], index: 3, kind: input, shape index: {}]   ;;  %s1782_s4 = inlined_call_operand.hbm [shape: f32[32,8], index: 4, kind: input, shape index: {}]   ;;  %s1783_s5 = inlined_call_operand.hbm [shape: f32[32,1], index: 5, kind: input, shape index: {}]   ;;  %s1784_s6 = inlined_call_operand.hbm [shape: f32[2,32,16], index: 6, kind: output, shape index: {}]  }
   0x1   :  { %1793 = sst [smem:[#allocation19_spill]] %s1779_s1 }
   0x2   :  { %11 = vsyncpa [#allocation3], 0 }
   0x3   :  { %13 = vsyncpa [#allocation3 + $0x1], 0 }
   0x4   :  { %14 = vsyncpa [#allocation6], 0 }
   0x5   :  { %15 = vsyncpa [#allocation9], 0 }
   0x6   :  { %16 = vsyncpa [#allocation12], 0 }
   0x7   :  { %17 = vsyncpa [#allocation4], 0 }
   0x8   :  { %19 = vsyncpa [#allocation4 + $0x1], 0  ;;  %s1411_s21 = smov 0   ;;  %s1413_s22 = smov 0  }
   0x9   :  { %s1415_s23 = smov 0   ;;  %s1417_s24 = smov 0  }
   0xa   :  { %s1419_s25 = smov 0   ;;  %s1421_s26 = smov 0  }
   0xb LB: > { %s1785_s27 = sadd.s32 4294967295, %s1359_s26   ;;  %p853_p0 = scmp.ge.s32.totalorder %s1359_s26, 1  ;;  %s1359_s26 = sphi %s1421_s26, %s25_s26   ;;  %s1355_s25 = sphi %s1419_s25, %s1817_s25   ;;  %s1351_s24 = sphi %s1417_s24, %s1816_s24   ;;  %s1347_s23 = sphi %s1415_s23, %s1815_s23   ;;  %s1343_s22 = sphi %s1413_s22, %s1814_s22   ;;  %s1339_s21 = sphi %s1411_s21, %s1813_s21  }
   0xc   : > { %p1445_p1 = scmp.eq.s32.totalorder %s1785_s27, 0  ;;  %p203_p2 = scmp.lt.s32.totalorder %s1359_s26, 3 }
   0xd   : > { %s1361_s30 = smov [#allocation5]   ;;  %s1362_s9 = smov [#allocation8]  }
   0xe   : > { %s1794_s28 = scalar_select %p1445_p1, 1, 0 }
   0xf   : > { %p1450_p3 = pnand %p853_p0, %p203_p2  ;;  %s215_s7 = sshll.u32 %s1361_s30, 4  ;;  %s1454_s7 = int_to_ptr.vmem [resolvable:$true] %s215_s7 }
  0x10   : > { %s240_s10 = sshll.u32 %s1362_s9, 4  ;;  %s1363_s11 = smov [#allocation7]   ;;  %s1465_s10 = int_to_ptr.vmem [resolvable:$true] %s240_s10 }
  0x11   : > { %s1795_s29 = scalar_select %p1450_p3, 1, 0 }
  0x12   : > { %p976_p4 = pneg %p1450_p3  ;;  %s1467_s12 = sshll.u32 %s1363_s11, 4  ;;  %s230_s12 = int_to_ptr.vmem [resolvable:$true] %s1467_s12 }
  0x13   : > { %s1797_s1 = sld [smem:[#allocation19_spill]] }
  0x14   : > { %p1461_p6 = pnand %p976_p4, %p1445_p1 }
  0x16   : > { %p1477_p8 = pneg %p1461_p6 }
  0x19   : > { %s1095_s15 = scalar_lea.hbm %s1797_s1, 512 }
  0x1a   : > { %p1096_p7 = scmp.ne.s32.totalorder %s1797_s1, %s1095_s15  ;;  %p1102_p11 = scmp.lt.u32.totalorder %s1095_s15, %s1797_s1 }
  0x1c   : > { %p1098_p9 = pnand %p1477_p8, %p1096_p7 }
  0x1e   : > { %p1099_p10 = pneg %p1098_p9 }
  0x20   : > { %p1104_p12 = pnand %p1102_p11, %p1099_p10 }
  0x22   : > { %1107 = shalt.err (!%p1104_p12)
}
  0x23   : > { %s1108_s30 = scalar_lea.vmem %s1454_s7, 512  ;;  %p1116_p4 = scmp.lt.s32.totalorder %s1454_s7, %s1454_s7 }
  0x24   : > { %p1109_p13 = scmp.ne.s32.totalorder %s1454_s7, %s1108_s30  ;;  %p1117_p5 = scmp.lt.s32.totalorder %s1108_s30, %s1108_s30 }
  0x26   : > { %p1111_p0 = pnand %p1109_p13, %p1477_p8  ;;  %p1118_p7 = por %p1117_p5, %p1116_p4 }
  0x28   : > { %p1112_p2 = pneg %p1111_p0 }
  0x2a   : > { %p1119_p9 = pnand %p1118_p7, %p1112_p2 }
  0x2c   : > { %1122 = shalt.err (!%p1119_p9)
}
  0x2d   : > { %s1789_s9 = smov 128   ;;  %s1791_s11 = smov 8  }
  0x2e   : > { %979 = dma.hbm_to_vmem [thread:$0]  (!%p1461_p6), %s1797_s1, 512, %s1454_s7, [#allocation6], %s1789_s9, %s1789_s9, %s1791_s11  }
  0x2f   : > { %s1123_s17 = scalar_lea.hbm %s1781_s3, 128 }
  0x30   : > { %p1124_p5 = scmp.ne.s32.totalorder %s1781_s3, %s1123_s17  ;;  %p1130_p12 = scmp.lt.u32.totalorder %s1123_s17, %s1781_s3 }
  0x32   : > { %p1126_p10 = pnand %p1124_p5, %p1477_p8 }
  0x34   : > { %p1127_p11 = pneg %p1126_p10 }
  0x36   : > { %p1132_p13 = pnand %p1130_p12, %p1127_p11 }
  0x38   : > { %1135 = shalt.err (!%p1132_p13)
}
  0x39   : > { %s1136_s7 = scalar_lea.vmem %s1465_s10, 128  ;;  %p1144_p7 = scmp.lt.s32.totalorder %s1465_s10, %s1465_s10 }
  0x3a   : > { %p1137_p0 = scmp.ne.s32.totalorder %s1465_s10, %s1136_s7  ;;  %p1145_p9 = scmp.lt.s32.totalorder %s1136_s7, %s1136_s7 }
  0x3c   : > { %p1139_p2 = pnand %p1137_p0, %p1477_p8  ;;  %p1146_p5 = por %p1145_p9, %p1144_p7 }
  0x3e   : > { %p1140_p4 = pneg %p1139_p2 }
  0x40   : > { %p1147_p10 = pnand %p1146_p5, %p1140_p4 }
  0x42   : > { %1150 = shalt.err (!%p1147_p10)
}
  0x43   : > { %985 = dma.hbm_to_vmem [thread:$0]  (!%p1461_p6), %s1781_s3, 128, %s1465_s10, [#allocation9]  }
  0x44   : > { %s1151_s16 = scalar_lea.hbm %s1780_s2, 128 }
  0x45   : > { %p1152_p11 = scmp.ne.s32.totalorder %s1780_s2, %s1151_s16  ;;  %p1158_p0 = scmp.lt.u32.totalorder %s1151_s16, %s1780_s2 }
  0x47   : > { %p1154_p12 = pnand %p1152_p11, %p1477_p8 }
  0x49   : > { %p1155_p13 = pneg %p1154_p12 }
  0x4b   : > { %p1160_p2 = pnand %p1158_p0, %p1155_p13 }
  0x4d   : > { %1163 = shalt.err (!%p1160_p2)
}
  0x4e   : > { %s1164_s7 = scalar_lea.vmem %s230_s12, 128  ;;  %p1172_p5 = scmp.lt.s32.totalorder %s230_s12, %s230_s12 }
  0x4f   : > { %p1165_p4 = scmp.ne.s32.totalorder %s230_s12, %s1164_s7  ;;  %p1173_p10 = scmp.lt.s32.totalorder %s1164_s7, %s1164_s7 }
  0x51   : > { %p1167_p7 = pnand %p1165_p4, %p1477_p8  ;;  %p1174_p3 = por %p1173_p10, %p1172_p5 }
  0x53   : > { %p1168_p9 = pneg %p1167_p7 }
  0x55   : > { %p1175_p1 = pnand %p1174_p3, %p1168_p9 }
  0x57   : > { %1178 = shalt.err (!%p1175_p1)
}
  0x58   : > { %982 = dma.hbm_to_vmem [thread:$0]  (!%p1461_p6), %s1780_s2, 128, %s230_s12, [#allocation6]  }
  0x59   : > { %s1366_s13 = smov [#allocation10]   ;;  %s1367_s15 = smov [#allocation11]  }
  0x5a   : > { %s250_s14 = sshll.u32 %s1366_s13, 4  ;;  %s263_s16 = sshll.u32 %s1367_s15, 4  ;;  %s251_s14 = int_to_ptr.vmem [resolvable:$true] %s250_s14  ;;  %s264_s16 = int_to_ptr.vmem [resolvable:$true] %s263_s16 }
  0x5b   : > { %s1179_s20 = scalar_lea.hbm %s1782_s4, 512 }
  0x5c   : > { %p1180_p1 = scmp.ne.s32.totalorder %s1782_s4, %s1179_s20  ;;  %p1186_p12 = scmp.lt.u32.totalorder %s1179_s20, %s1782_s4 }
  0x5e   : > { %p1182_p3 = pnand %p1180_p1, %p1477_p8 }
  0x60   : > { %p1183_p11 = pneg %p1182_p3 }
  0x62   : > { %p1188_p13 = pnand %p1186_p12, %p1183_p11 }
  0x64   : > { %1191 = shalt.err (!%p1188_p13)
}
  0x65   : > { %s1192_s12 = scalar_lea.vmem %s251_s14, 512  ;;  %p1200_p7 = scmp.lt.s32.totalorder %s251_s14, %s251_s14 }
  0x66   : > { %p1193_p0 = scmp.ne.s32.totalorder %s251_s14, %s1192_s12  ;;  %p1201_p9 = scmp.lt.s32.totalorder %s1192_s12, %s1192_s12 }
  0x68   : > { %p1195_p2 = pnand %p1193_p0, %p1477_p8  ;;  %p1202_p5 = por %p1201_p9, %p1200_p7 }
  0x6a   : > { %p1196_p4 = pneg %p1195_p2 }
  0x6c   : > { %p1203_p10 = pnand %p1202_p5, %p1196_p4 }
  0x6e   : > { %1206 = shalt.err (!%p1203_p10)
}
  0x6f   : > { %s1799_s27 = smov 128   ;;  %s1207_s19 = scalar_lea.hbm %s1783_s5, 512 }
  0x70   : > { %988 = dma.hbm_to_vmem [thread:$0]  (!%p1461_p6), %s1782_s4, 512, %s251_s14, [#allocation9], %s1799_s27, %s1799_s27, %s1791_s11  }
  0x71   : > { %p1208_p1 = scmp.ne.s32.totalorder %s1783_s5, %s1207_s19  ;;  %p1214_p12 = scmp.lt.u32.totalorder %s1207_s19, %s1783_s5 }
  0x73   : > { %p1210_p3 = pnand %p1208_p1, %p1477_p8 }
  0x75   : > { %p1211_p11 = pneg %p1210_p3 }
  0x77   : > { %p1216_p13 = pnand %p1214_p12, %p1211_p11 }
  0x79   : > { %1219 = shalt.err (!%p1216_p13)
}
  0x7a   : > { %s1220_s12 = scalar_lea.vmem %s264_s16, 512  ;;  %p1228_p7 = scmp.lt.s32.totalorder %s264_s16, %s264_s16 }
  0x7b   : > { %p1221_p0 = scmp.ne.s32.totalorder %s264_s16, %s1220_s12  ;;  %p1229_p9 = scmp.lt.s32.totalorder %s1220_s12, %s1220_s12 }
  0x7d   : > { %p1223_p2 = pnand %p1221_p0, %p1477_p8  ;;  %p1230_p5 = por %p1229_p9, %p1228_p7 }
  0x7f   : > { %p1224_p4 = pneg %p1223_p2 }
  0x81   : > { %p1231_p10 = pnand %p1230_p5, %p1224_p4 }
  0x83   : > { %1234 = shalt.err (!%p1231_p10)
}
  0x84   : > { %991 = dma.hbm_to_vmem [thread:$0]  (!%p1461_p6), %s1783_s5, 512, %s264_s16, [#allocation12], %s1799_s27, %s1799_s27, %s1791_s11  }
  0x85   : > { %s852_s8 = sadd.s32 4294967294, %s1359_s26   ;;  %s37_s18 = sadd.s32 1, %s1355_s25 }
  0x86   : > { %s46_s13 = sadd.s32 1, %s1347_s23  ;;  %p39_p8 = scmp.ge.s32.totalorder %s37_s18, 2 }
  0x87   : > { %p53_p1 = scmp.ne.s32.totalorder %s1347_s23, %s1343_s22  ;;  %p54_p3 = scmp.eq.s32.totalorder %s1359_s26, 0 }
  0x88   : > { %p59_p11 = scmp.ne.s32.totalorder %s1343_s22, %s1339_s21  ;;  %s1819_s18 = smov (%p39_p8, %s37_s18), 0 }
  0x89   : > { %p1595_p12 = por %p54_p3, %p53_p1  ;;  %p1801_p13 = scmp.ne.s32.totalorder %s1794_s28, 0 }
  0x8a   : > { %s41_s17 = ssub.s32 %s1355_s25, %s1819_s18  ;;  %s1803_s19 = sadd.s32 4294967295, %s1359_s26  }
  0x8b   : > { %p1601_p6 = por %p1801_p13, %p59_p11  ;;  %p190_p0 = scmp.eq.s32.totalorder %s1803_s19, 1 }
  0x8c   : > { %p44_p2 = scmp.eq.s32.totalorder %s41_s17, 0  ;;  %p196_p4 = scmp.eq.s32.totalorder %s852_s8, 1 }
  0x8d   : > { %p1609_p7 = por %p190_p0, %p53_p1  ;;  %p1005_p9 = scmp.lt.s32.totalorder %s1359_s26, 2 }
  0x8e   : > { %s1615_s30 = scalar_select %p44_p2, %s1347_s23, %s46_s13  }
  0x8f   : > { %s1804_s20 = scalar_select %p1609_p7, 1, 0 }
  0x90   : > { %p1617_p5 = por %p196_p4, %p59_p11  ;;  %s277_s10 = sand.u32 1, %s1347_s23  }
  0x91   : > { %s860_s12 = sshll.u32 %s277_s10, 5  ;;  %s885_s14 = sshll.u32 %s1355_s25, 9 }
  0x92   : > { %s1805_s7 = scalar_select %p1617_p5, 1, 0 }
  0x93   : > { %s1626_s19 = scalar_lea.hbm %s1778_s0, %s885_s14  ;;  %s281_s8 = scalar_lea.vmem [#allocation2], %s860_s12 }
  0x94   : > { %s289_s17 = sshll.u32 %s281_s8, 4  ;;  %p1632_p10 = pnand %p1005_p9, %p1595_p12  ;;  %s1628_s17 = int_to_ptr.vmem [resolvable:$true] %s289_s17 }
  0x95   : > { %s1636_s1 = scalar_lea.sflag [#allocation3], %s277_s10  ;;  %s1235_s11 = scalar_lea.hbm %s1626_s19, 512 }
  0x96   : > { %p1236_p8 = scmp.ne.s32.totalorder %s1626_s19, %s1235_s11  ;;  %p1237_p1 = pneg %p1632_p10 }
  0x97   : > { %s1240_s15 = scalar_lea.hbm %s1778_s0, 1024  ;;  %p1241_p12 = scmp.lt.u32.totalorder %s1626_s19, %s1778_s0 }
  0x98   : > { %p1238_p3 = pnand %p1237_p1, %p1236_p8  ;;  %p1242_p13 = scmp.lt.u32.totalorder %s1240_s15, %s1235_s11 }
  0x99   : > { %p1244_p2 = scmp.lt.u32.totalorder %s1235_s11, %s1626_s19 }
  0x9a   : > { %p1239_p11 = pneg %p1238_p3  ;;  %p1243_p0 = por %p1242_p13, %p1241_p12 }
  0x9c   : > { %p1245_p4 = por %p1244_p2, %p1243_p0 }
  0x9e   : > { %p1246_p9 = pnand %p1245_p4, %p1239_p11 }
  0xa0   : > { %1249 = shalt.err (!%p1246_p9)
}
  0xa1   : > { %s1250_s10 = scalar_lea.vmem %s1628_s17, 512  ;;  %s1368_s12 = smov [#allocation2]  }
  0xa2   : > { %p1251_p8 = scmp.ne.s32.totalorder %s1628_s17, %s1250_s10  ;;  %s1255_s14 = sshll.u32 %s1368_s12, 4  ;;  %s1256_s14 = int_to_ptr.vmem [resolvable:$false] %s1255_s14 }
  0xa3   : > { %s1257_s9 = scalar_lea.vmem %s1256_s14, 1024  ;;  %p1258_p7 = scmp.lt.s32.totalorder %s1628_s17, %s1256_s14 }
  0xa4   : > { %p1253_p3 = pnand %p1251_p8, %p1237_p1  ;;  %p1259_p12 = scmp.lt.s32.totalorder %s1257_s9, %s1250_s10 }
  0xa6   : > { %p1254_p5 = pneg %p1253_p3  ;;  %p1260_p13 = por %p1259_p12, %p1258_p7 }
  0xa8   : > { %p1261_p0 = pnand %p1260_p13, %p1254_p5 }
  0xaa   : > { %1264 = shalt.err (!%p1261_p0)
}
  0xab   : > { %s1807_s11 = smov 8   ;;  %p1808_p1 = scmp.ne.s32.totalorder %s1795_s29, 0 }
  0xac   : > { %995 = dma.hbm_to_vmem [thread:$0]  (!%p1632_p10), %s1626_s19, 512, %s1628_s17, %s1636_s1, %s1799_s27, %s1799_s27, %s1807_s11  }
  0xad   : > { %301 = sbr.rel (%p1808_p1) target bundleno = 931 (0x3a3), region = 44  ;;  %s1670_s15 = sand.u32 (!%p1808_p1), 1, %s1343_s22  }
  0xae   : > { %s864_s8 = sshll.u32 (!%p1808_p1), %s1670_s15, 5  ;;  %s304_s10 = scalar_lea.sflag (!%p1808_p1), [#allocation3], %s1670_s15 }
  0xaf   : > { %s307_s13 = scalar_lea.vmem (!%p1808_p1), [#allocation2], %s864_s8 }
  0xb4   : > { %1318 = dma.done.wait (%p1601_p6), %s304_s10, 512  }
  0xb5   : > { %1320 = vsyncadd (%p1601_p6), %s304_s10, 4294966784  ;;  %p1809_p7 = scmp.ne.s32.totalorder %s1794_s28, 0 }
  0xb7   : > { %1322 = dma.done.wait (%p1809_p7), [#allocation6], 640  }
  0xb8   : > { %1324 = vsyncadd (%p1809_p7), [#allocation6], 4294966656 }
  0xb9   : > { %1326 = dma.done.wait (%p1809_p7), [#allocation9], 640  }
  0xba   : > { %1328 = vsyncadd (%p1809_p7), [#allocation9], 4294966656 }
  0xbb   : > { %1330 = dma.done.wait (%p1809_p7), [#allocation12], 512  }
  0xbc   : > { %1332 = vsyncadd (%p1809_p7), [#allocation12], 4294966784  ;;  %vm364_vm0 = vcmask 261120   ;;  %v1692_v0 = vld [vmem:[%s307_s13] sm:$0xff]  ;;  %v1694_v1 = vld [vmem:[%s307_s13 + $0x8] sm:$0xff]  ;;  %v1369_v10 = vmov 0.0|0.0  }
  0xbd   : > { %v1696_v2 = vld [vmem:[%s307_s13 + $0x10] sm:$0xff]  ;;  %v938_v3 = vpack.c.bf16 %v1694_v1, %v1692_v0  ;;  %v1700_v4 = vld [vmem:[%s307_s13 + $0x18] sm:$0xff]  ;;  %v360_v5 = vld [vmem:[#allocation5] sm:$0xff]  ;;  %946 = vmatprep.subr.bf16.mxu1 %v1369_v10  ;;  %vm1370_vm1 = vmmov 0   ;;  %v1371_v11 = vmov 0.0   ;;  %v1372_v13 = vmov 0  }
  0xbe   : > { %v942_v6 = vpack.c.bf16 %v1700_v4, %v1696_v2  ;;  %913 = vmatprep.mubr.msk.f32.mxu0 %vm364_vm0, %v360_v5  ;;  %v361_v7 = vld [vmem:[#allocation5 + $0x8] sm:$0xff]  ;;  %v362_v8 = vld [vmem:[#allocation5 + $0x10] sm:$0xff]  ;;  %v363_v9 = vld [vmem:[#allocation5 + $0x18] sm:$0xff]  ;;  %927 = vmatprep.mubr.msk.f32.mxu1 %vm1370_vm1, %v1371_v11  ;;  %vm576_vm2 = vcmask 64512   ;;  %vm698_vm3 = vcmask 130048   ;;  %s886_s1 = sshll.u32 %s1351_s24, 9 }
  0xbf   : > { %939 = vmatprep.subr.bf16.mxu0 %v938_v3  ;;  %v463_v12 = vld [vmem:[#allocation8] sm:$0xff]  ;;  %1073 = vset.pattern.permute.xlu0 %v1372_v13  ;;  %v552_v14 = vld [vmem:[#allocation11] sm:$0xff]  ;;  %v462_v22 = vld [vmem:[#allocation7] sm:$0xff]  ;;  %s355_s28 = scalar_lea.vmem [#allocation13], %s864_s8  ;;  %s1724_s19 = scalar_lea.hbm %s1784_s6, %s886_s1 }
  0xc0   : > { %941 = vmatpush3.bf16.msra.mxu0 %v938_v3  ;;  %1074 = vset.pattern.permute.xlu1 %v1372_v13  ;;  %v555_v15 = vld [vmem:[#allocation11 + $0x18] sm:$0xff]  ;;  %v548_v23 = vld [vmem:[#allocation10] sm:$0xff]  ;;  %v553_v24 = vld [vmem:[#allocation11 + $0x8] sm:$0xff]  ;;  %s718_s29 = sshll.u32 %s355_s28, 4  ;;  %s704_s24 = scalar_lea.sflag [#allocation4], %s1670_s15  ;;  %s1726_s29 = int_to_ptr.vmem [resolvable:$true] %s718_s29 }
  0xc1   : > { %943 = vmatprep.subr.bf16.mxu0 %v942_v6  ;;  %466 = vperm.xlu0 %1073, %v463_v12   ;;  %v554_v25 = vld [vmem:[#allocation11 + $0x10] sm:$0xff]  ;;  %v549_v36 = vld [vmem:[#allocation10 + $0x8] sm:$0xff]  ;;  %v551_v38 = vld [vmem:[#allocation10 + $0x18] sm:$0xff]  ;;  %s1265_s17 = scalar_lea.vmem %s1726_s29, 512  ;;  %p1810_p5 = scmp.ne.s32.totalorder %s1804_s20, 0 }
  0xc2   : > { %563 = vperm.xlu1 %1074, %v553_v24   ;;  %v550_v37 = vld [vmem:[#allocation10 + $0x10] sm:$0xff]  ;;  %p1266_p6 = scmp.ne.s32.totalorder %s1726_s29, %s1265_s17  ;;  %s1373_s12 = smov [#allocation13]  }
  0xc3   : > { %s1269_s14 = sshll.u32 %s1373_s12, 4  ;;  %s1270_s14 = int_to_ptr.vmem [resolvable:$false] %s1269_s14 }
  0xc4   : > { %945 = vmatpush3.bf16.msra.mxu0 %v942_v6  ;;  %p1267_p10 = pnand %p1266_p6, %p1810_p5  ;;  %s1271_s9 = scalar_lea.vmem %s1270_s14, 1024 }
  0xc5   : > { %558 = vperm.xlu0 %1073, %v552_v14   ;;  %p1272_p2 = scmp.lt.s32.totalorder %s1726_s29, %s1270_s14  ;;  %p1273_p4 = scmp.lt.s32.totalorder %s1271_s9, %s1265_s17 }
  0xc6   : > { %568 = vperm.xlu1 %1074, %v554_v25   ;;  %p1268_p11 = pneg %p1267_p10 }
  0xc7   : > { %914 = vmatmul.mubr.msk.f32.vlgmr.msra.gmra.mrb[0].mxu0 %vm364_vm0, %v361_v7  ;;  %p1274_p9 = por %p1273_p4, %p1272_p2 }
  0xc8   : > { %916 = vmatprep.mubr.msk.f32.mxu0 %vm364_vm0, %v362_v8 }
  0xc9   : > { %573 = vperm.xlu0 %1073, %v555_v15   ;;  %p1275_p8 = pnand %p1274_p9, %p1268_p11 }
  0xcb   : > { %917 = vmatmul.mubr.msk.f32.gmra.mrb[2].mxu0 %vm364_vm0, %v363_v9 }
 0x140   : > { %v467_v26 = vpop.permute.xlu0 %466 }
 0x141   : > { %v564_v40 = vpop.permute.xlu1 %563 }
 0x144   : > { %v559_v39 = vpop.permute.xlu0 %558 }
 0x145   : > { %v569_v50 = vpop.permute.xlu1 %568 }
 0x148   : > { %v574_v46 = vpop.permute.xlu0 %573 }
 0x19a   : > { %v915_v16 = vpop.f32.mrb[0].mxu0 }
 0x19b   : > { %v443_v17 = vpop.f32.mrb[1].mxu0 }
 0x19c   : > { %v947_v18 = vpack.c.bf16 %v915_v16, %v443_v17 }
 0x19e   : > { %v918_v19 = vpop.f32.mrb[2].mxu0  ;;  %948 = vmatpush3.bf16.msra.mxu1 %v947_v18 }
 0x19f   : > { %v453_v20 = vpop.f32.mrb[3].mxu0  ;;  %949 = vmatprep.subr.bf16.mxu1 %v1369_v10 }
 0x1a0   : > { %v950_v21 = vpack.c.bf16 %v918_v19, %v453_v20 }
 0x1a2   : > { %951 = vmatpush3.bf16.msra.mxu1 %v950_v21 }
 0x1a5   : > { %928 = vmatmul.mubr.msk.f32.vlgmr.msra.gmra.mrb[0].mxu1 %vm364_vm0, %v462_v22 }
 0x1a6   : > { %932 = vmatprep.mubr.msk.f32.mxu1 %vm576_vm2, %v548_v23 }
 0x278   : > { %v538_v27 = vpop.f32.mrb[0].mxu1 }
 0x279   : > { %v539_v28 = vadd.f32 %v538_v27, %v467_v26  ;;  %v929_v29 = vpop.f32.mrb[1].mxu1 }
 0x27b   : > { %v542_v30 = vsub.f32 0.0, %v539_v28 }
 0x27d   : > { %v543_v31 = vmul.f32 1.442695, %v542_v30 }
 0x27f   : > { %1075 = vpow2.f32 %v543_v31 }
 0x289   : > { %v1076_v32 = vpop.eup %1075 }
 0x28a   : > { %v545_v33 = vadd.f32 1.0, %v1076_v32 }
 0x28c   : > { %1077 = vrcp.f32 %v545_v33 }
 0x296   : > { %v1078_v34 = vpop.eup %1077 }
 0x297   : > { %v547_v35 = vmul.f32 %v1078_v34, %v539_v28 }
 0x299   : > { %930 = vmatprep.subr.mxu1 %v547_v35 }
 0x29a   : > { %931 = vmatpush3.msra.mxu1 %v547_v35 }
 0x29b   : > { %933 = vmatmul.mubr.msk.f32.vlgmr.msra.gmra.mrb[2].mxu1 %vm576_vm2, %v549_v36 }
 0x29c   : > { %935 = vmatprep.mubr.msk.f32.mxu1 %vm576_vm2, %v550_v37 }
 0x29f   : > { %936 = vmatmul.mubr.msk.f32.gmra.mrb[4].mxu1 %vm576_vm2, %v551_v38 }
 0x36e   : > { %v934_v41 = vpop.f32.mrb[2].mxu1 }
 0x36f   : > { %v661_v42 = vadd.f32 %v934_v41, %v564_v40  ;;  %v655_v43 = vpop.f32.mrb[3].mxu1 }
 0x370   : > { %v656_v44 = vadd.f32 %v655_v43, %v559_v39 }
 0x371   : > { %v675_v45 = vsub.f32 0.0, %v661_v42 }
 0x372   : > { %v674_v47 = vsub.f32 0.0, %v656_v44  ;;  %v937_v48 = vpop.f32.mrb[4].mxu1 }
 0x373   : > { %v680_v49 = vmul.f32 1.442695, %v675_v45  ;;  %v671_v51 = vadd.f32 %v937_v48, %v574_v46  ;;  %v665_v52 = vpop.f32.mrb[5].mxu1 }
 0x374   : > { %v678_v53 = vmul.f32 1.442695, %v674_v47  ;;  %v666_v54 = vadd.f32 %v665_v52, %v569_v50 }
 0x375   : > { %1079 = vpow2.f32 %v680_v49  ;;  %v677_v55 = vsub.f32 0.0, %v671_v51 }
 0x376   : > { %1081 = vpow2.f32 %v678_v53  ;;  %v676_v56 = vsub.f32 0.0, %v666_v54 }
 0x377   : > { %v684_v57 = vmul.f32 1.442695, %v677_v55 }
 0x378   : > { %v682_v58 = vmul.f32 1.442695, %v676_v56 }
 0x379   : > { %1083 = vpow2.f32 %v684_v57 }
 0x37a   : > { %1085 = vpow2.f32 %v682_v58 }
 0x37f   : > { %v1080_v59 = vpop.eup %1079 }
 0x380   : > { %v1082_v60 = vpop.eup %1081  ;;  %v687_v61 = vadd.f32 1.0, %v1080_v59 }
 0x381   : > { %v686_v62 = vadd.f32 1.0, %v1082_v60 }
 0x382   : > { %1087 = vrcp.f32 %v687_v61 }
 0x383   : > { %v1084_v63 = vpop.eup %1083  ;;  %1089 = vrcp.f32 %v686_v62 }
 0x384   : > { %v1086_v3 = vpop.eup %1085  ;;  %v689_v5 = vadd.f32 1.0, %v1084_v63 }
 0x385   : > { %v688_v6 = vadd.f32 1.0, %v1086_v3 }
 0x386   : > { %1091 = vrcp.f32 %v689_v5 }
 0x387   : > { %1093 = vrcp.f32 %v688_v6 }
 0x38c   : > { %v1088_v7 = vpop.eup %1087 }
 0x38d   : > { %v1090_v8 = vpop.eup %1089  ;;  %v695_v9 = vmul.f32 %v1088_v7, %v1694_v1 }
 0x38e   : > { %v694_v10 = vmul.f32 %v1090_v8, %v1692_v0 }
 0x38f   : > { %700 = vst.msk [vmem:[%s355_s28 + $0x8] sm:$0xff] %vm698_vm3, %v695_v9 }
 0x390   : > { %v1092_v11 = vpop.eup %1091  ;;  %699 = vst.msk [vmem:[%s355_s28] sm:$0xff] %vm698_vm3, %v694_v10 }
 0x391   : > { %v1094_v12 = vpop.eup %1093  ;;  %v697_v13 = vmul.f32 %v1092_v11, %v1700_v4 }
 0x392   : > { %v696_v0 = vmul.f32 %v1094_v12, %v1696_v2 }
 0x393   : > { %702 = vst.msk [vmem:[%s355_s28 + $0x18] sm:$0xff] %vm698_vm3, %v697_v13 }
 0x394   : > { %701 = vst.msk [vmem:[%s355_s28 + $0x10] sm:$0xff] %vm698_vm3, %v696_v0 }
 0x395   : > { %1278 = shalt.err (!%p1275_p8)
}
 0x396   : > { %s1279_s11 = scalar_lea.hbm %s1724_s19, 512  ;;  %s1283_s13 = scalar_lea.hbm %s1784_s6, 1024 }
 0x397   : > { %p1280_p3 = scmp.ne.s32.totalorder %s1724_s19, %s1279_s11  ;;  %p1284_p0 = scmp.lt.u32.totalorder %s1724_s19, %s1784_s6 }
 0x398   : > { %p1285_p1 = scmp.lt.u32.totalorder %s1283_s13, %s1279_s11  ;;  %p1287_p6 = scmp.lt.u32.totalorder %s1279_s11, %s1724_s19 }
 0x399   : > { %p1281_p12 = pnand %p1280_p3, %p1810_p5 }
 0x39a   : > { %p1286_p7 = por %p1285_p1, %p1284_p0 }
 0x39b   : > { %p1282_p13 = pneg %p1281_p12 }
 0x39c   : > { %p1288_p10 = por %p1287_p6, %p1286_p7 }
 0x39e   : > { %p1289_p11 = pnand %p1288_p10, %p1282_p13 }
 0x3a0   : > { %1292 = shalt.err (!%p1289_p11)
}
 0x3a1   : > { %s1374_s27 = smov 128   ;;  %s1375_s16 = smov 8  }
 0x3a2   : > { %974 = dma.vmem_to_hbm [thread:$0]  (%p1810_p5), %s1726_s29, 512, %s1724_s19, %s704_s24, %s1374_s27, %s1374_s27, %s1375_s16  }
 0x3a3 PF: > { %s733_s17 = sand.u32 1, %s1339_s21   ;;  %p1811_p2 = scmp.ne.s32.totalorder %s1805_s7, 0 }
 0x3a4   : > { %p1812_p4 = scmp.ge.s32.totalorder %s1359_s26, 2  ;;  %s734_s12 = scalar_lea.sflag [#allocation4], %s733_s17 }
 0x3a6   : > { %p997_p9 = pnand %p1812_p4, %p1811_p2 }
 0x3a8   : > { %1334 = dma.done.wait (!%p997_p9), %s734_s12, 512  }
 0x3a9   : > { %1336 = vsyncadd (!%p997_p9), %s734_s12, 4294966784  ;;  %s25_s26 = sadd.s32 1, %s1359_s26   ;;  %s1813_s21 = smov %s1343_s22 }
 0x3aa   : > { %p22_p8 = scmp.ge.s32.totalorder %s25_s26, 4   ;;  %s1814_s22 = smov %s1347_s23 }
 0x3ab   : > { %s1815_s23 = smov %s1615_s30  ;;  %s1816_s24 = smov %s1355_s25 }
 0x3ac   : > { %s1817_s25 = smov %s1819_s18  ;;  %24 = sbr.rel (!%p22_p8) target bundleno = 11 (0xb), region = 109 }
 0x3b3   :  { %739 = vsyncpa [#allocation3], 1 }
 0x3b4   :  { %741 = vsyncpa [#allocation3 + $0x1], 1 }
 0x3b5   :  { %742 = vsyncpa [#allocation6], 1 }
 0x3b6   :  { %743 = vsyncpa [#allocation9], 1 }
 0x3b7   :  { %744 = vsyncpa [#allocation12], 1 }
 0x3b8   :  { %745 = vsyncpa [#allocation4], 1 }
 0x3b9   :  { %747 = vsyncpa [#allocation4 + $0x1], 1 }

</bundles_post_ra>
